<compile_context>
chip_gen: v5e
topology: v5e:2x2
jax: 0.10.0
libtpu: 0.0.40
codegen_flags: <defaults>
</compile_context>

<pallas_src>
import functools

import jax
import jax.numpy as jnp
import numpy as np
from jax import lax
from jax.experimental import pallas as pl
from jax.experimental.pallas import tpu as pltpu


_FULL_UNROLL_MAX = 32     # fully unroll the recurrence for chunks up to this
_TARGET_CHUNK = 256       # cap on time-chunk length (VMEM-friendly on v7x)


def _pick_chunk_len(T, target=_TARGET_CHUNK):
    """Largest divisor of T that is <= target (so no ragged last chunk)."""
    if T <= target:
        return T
    for tc in range(target, 0, -1):
        if T % tc == 0:
            return tc
    return T


def _lstm_chunk_kernel(x_ref, w_ih_ref, w_hh_ref, b_ref, h0_ref, c0_ref,
                       h_all_ref, h_n_ref, c_n_ref,
                       h_scr, c_scr,
                       *, chunk_len, hidden_size, mxu_dtype):
    """Runs one time-chunk of the LSTM recurrence.

    Grid: (T // chunk_len,), serial ("arbitrary"); (h, c) carried across
    chunks in VMEM scratch.

    x_ref:      (Tc, B, I)  time-major input chunk
    w_ih_ref:   (I, 4H)     input->hidden weights (transposed, gate order i|f|g|o)
    w_hh_ref:   (H, 4H)     hidden->hidden weights (transposed)
    b_ref:      (1, 4H)     b_ih + b_hh
    h0_ref:     (B, H)      initial hidden state (used only on chunk 0)
    c0_ref:     (B, H)      initial cell state   (used only on chunk 0)
    h_all_ref:  (Tc, B, H)  hidden states of this chunk (Linear applied outside)
    h_n_ref:    (B, H)      final hidden state (written on last chunk only)
    c_n_ref:    (B, H)      final cell state   (written on last chunk only)
    h_scr,c_scr:(B, H)      VMEM carry across chunks
    """
    H = hidden_size
    chunk = pl.program_id(0)

    @pl.when(chunk == 0)
    def _():
        h_scr[...] = h0_ref[...]
        c_scr[...] = c0_ref[...]

    # Invariant loads hoisted out of the recurrence (JAX does not CSE them).
    # Optional bf16 MXU operands (v6e/v7x); accumulation stays f32.
    w_ih = w_ih_ref[...].astype(mxu_dtype)
    w_hh = w_hh_ref[...].astype(mxu_dtype)
    bias = b_ref[...]

    def step(t, carry):
        h_prev, c_prev = carry
        # Fused input projection: x_t load + x_t @ W_ih are independent of the
        # recurrent chain, so (once unrolled) they hide under the previous
        # step's MXU/EUP latency.
        x_t = x_ref[t].astype(mxu_dtype)                       # (B, I)
        gates = (jnp.dot(x_t, w_ih, preferred_element_type=jnp.float32)
                 + jnp.dot(h_prev.astype(mxu_dtype), w_hh,
                           preferred_element_type=jnp.float32)
                 + bias)                                       # (B, 4H) f32
        # One lane-dense EUP pass over all 4H gate lanes, then slice;
        # only the g-gate needs a separate tanh.
        s = jax.nn.sigmoid(gates)
        i_g = s[:, 0 * H:1 * H]
        f_g = s[:, 1 * H:2 * H]
        o_g = s[:, 3 * H:4 * H]
        g_g = jnp.tanh(gates[:, 2 * H:3 * H])
        c_new = f_g * c_prev + i_g * g_g
        h_new = o_g * jnp.tanh(c_new)
        h_all_ref[t] = h_new
        return (h_new, c_new)

    carry = (h_scr[...], c_scr[...])
    if chunk_len <= _FULL_UNROLL_MAX:
        # Fully unrolled: static indices, full scheduling visibility.
        for t in range(chunk_len):
            carry = step(t, carry)
    else:
        carry = lax.fori_loop(0, chunk_len, step, carry, unroll=8)
    h_last, c_last = carry

    # Carry state to the next chunk.
    h_scr[...] = h_last
    c_scr[...] = c_last

    @pl.when(chunk == pl.num_programs(0) - 1)
    def _():
        h_n_ref[...] = h_last
        c_n_ref[...] = c_last


def predictive_network_forward(x, params, hidden_state=None, *,
                               chunk_len=None, mxu_dtype=jnp.float32):
    """x: (B, T, input_size) float32 (PyTorch batch_first convention).

    Returns (y, (h_n, c_n)) with y: (B, T, output_size), matching
    PredictiveNetwork.forward; pass the returned state back in to reproduce
    the module's persistent self.hidden_state behaviour.
    Set mxu_dtype=jnp.bfloat16 on v6e/v7x for faster MXU passes (loosen
    tolerances accordingly).
    """
    w_ih_t, w_hh_t, b, w_lin_t, b_lin = params
    B, T, I = x.shape
    H = w_hh_t.shape[0]
    O = w_lin_t.shape[1]

    # Time-major layout for the kernel; this moves T*B*I*4 bytes, 32x less
    # than the gates_x (T*B*4H*4) HBM materialization it replaces.
    x_tm = jnp.transpose(x, (1, 0, 2))                          # (T, B, I)

    Tc = _pick_chunk_len(T) if chunk_len is None else chunk_len
    assert T % Tc == 0, (T, Tc)
    n_chunks = T // Tc

    if hidden_state is None:
        h0 = jnp.zeros((B, H), jnp.float32)
        c0 = jnp.zeros((B, H), jnp.float32)
    else:
        h0, c0 = hidden_state

    kernel = functools.partial(_lstm_chunk_kernel, chunk_len=Tc,
                               hidden_size=H, mxu_dtype=mxu_dtype)

    h_all, h_n, c_n = pl.pallas_call(
        kernel,
        out_shape=(jax.ShapeDtypeStruct((T, B, H), jnp.float32),
                   jax.ShapeDtypeStruct((B, H), jnp.float32),
                   jax.ShapeDtypeStruct((B, H), jnp.float32)),
        grid_spec=pltpu.PrefetchScalarGridSpec(
            num_scalar_prefetch=0,
            grid=(n_chunks,),                       # serial time chunks
            in_specs=[
                pl.BlockSpec((Tc, B, I), lambda c: (c, 0, 0)),   # x chunk
                pl.BlockSpec((I, 4 * H), lambda c: (0, 0)),      # W_ih^T
                pl.BlockSpec((H, 4 * H), lambda c: (0, 0)),      # W_hh^T
                pl.BlockSpec((1, 4 * H), lambda c: (0, 0)),      # bias
                pl.BlockSpec((B, H), lambda c: (0, 0)),          # h0
                pl.BlockSpec((B, H), lambda c: (0, 0)),          # c0
            ],
            out_specs=[
                pl.BlockSpec((Tc, B, H), lambda c: (c, 0, 0)),   # h_all
                pl.BlockSpec((B, H), lambda c: (0, 0)),          # h_n
                pl.BlockSpec((B, H), lambda c: (0, 0)),          # c_n
            ],
            scratch_shapes=[pltpu.VMEM((B, H), jnp.float32),     # h carry
                            pltpu.VMEM((B, H), jnp.float32)],    # c carry
        ),
        compiler_params=pltpu.CompilerParams(
            # Serial recurrence across chunks -> must stay "arbitrary".
            dimension_semantics=("arbitrary",),
        ),
    )(x_tm, w_ih_t, w_hh_t, b, h0, c0)

    # Hoisted output Linear: one lane-dense matmul, fused back to batch-first.
    y = jnp.einsum('tbh,ho->bto', h_all, w_lin_t,
                   preferred_element_type=jnp.float32) + b_lin   # (B, T, O)
    return y, (h_n, c_n)


def predictive_network_ref(x, params, hidden_state=None):
    """Pure-JAX reference (lax.scan LSTM + Linear), same math as PyTorch."""
    w_ih_t, w_hh_t, b, w_lin_t, b_lin = params
    B, T, I = x.shape
    H = w_hh_t.shape[0]

    if hidden_state is None:
        init = (jnp.zeros((B, H), jnp.float32), jnp.zeros((B, H), jnp.float32))
    else:
        init = hidden_state

    def step(carry, x_t):
        h, c = carry
        gates = x_t @ w_ih_t + h @ w_hh_t + b
        i_g = jax.nn.sigmoid(gates[:, 0 * H:1 * H])
        f_g = jax.nn.sigmoid(gates[:, 1 * H:2 * H])
        g_g = jnp.tanh(gates[:, 2 * H:3 * H])
        o_g = jax.nn.sigmoid(gates[:, 3 * H:4 * H])
        c = f_g * c + i_g * g_g
        h = o_g * jnp.tanh(c)
        y = h @ w_lin_t + b_lin
        return (h, c), y

    (h_n, c_n), ys = lax.scan(step, init, jnp.transpose(x, (1, 0, 2)))
    return jnp.transpose(ys, (1, 0, 2)), (h_n, c_n)


def init_params(key, input_size, hidden_size, output_size):
    """Deterministic parameter init (shapes match nn.LSTM + nn.Linear)."""
    k1, k2, k3, k4, k5, k6 = jax.random.split(key, 6)
    s = 1.0 / np.sqrt(hidden_size)
    # PyTorch stores W_ih: (4H, I), W_hh: (4H, H), Linear W: (O, H); we keep
    # them pre-transposed for row-major `x @ W` matmuls.
    w_ih_t = jax.random.uniform(k1, (input_size, 4 * hidden_size),
                                jnp.float32, -s, s)
    w_hh_t = jax.random.uniform(k2, (hidden_size, 4 * hidden_size),
                                jnp.float32, -s, s)
    b_ih = jax.random.uniform(k3, (1, 4 * hidden_size), jnp.float32, -s, s)
    b_hh = jax.random.uniform(k4, (1, 4 * hidden_size), jnp.float32, -s, s)
    w_lin_t = jax.random.uniform(k5, (hidden_size, output_size),
                                 jnp.float32, -s, s)
    b_lin = jax.random.uniform(k6, (1, output_size), jnp.float32, -s, s)
    return (w_ih_t, w_hh_t, b_ih + b_hh, w_lin_t, b_lin)


if __name__ == "__main__":
    # Small shapes consistent with the module's forward():
    #   x: (batch=2, seq=8, input_size=4), hidden_size=32, output_size=3
    B, T, INPUT, HIDDEN, OUTPUT = 2, 8, 4, 32, 3

    key = jax.random.PRNGKey(0)
    k_x, k_x2, k_p = jax.random.split(key, 3)
    x = jax.random.normal(k_x, (B, T, INPUT), jnp.float32)
    params = init_params(k_p, INPUT, HIDDEN, OUTPUT)

    # First forward() call: hidden_state is None -> zeros.
    y, state = predictive_network_forward(x, params)
    y = jax.block_until_ready(y)
    y_ref, state_ref = predictive_network_ref(x, params)
    assert y.shape == (B, T, OUTPUT), y.shape
    np.testing.assert_allclose(np.asarray(y), np.asarray(y_ref),
                               rtol=1e-5, atol=1e-5)
    np.testing.assert_allclose(np.asarray(state[0]), np.asarray(state_ref[0]),
                               rtol=1e-5, atol=1e-5)
    np.testing.assert_allclose(np.asarray(state[1]), np.asarray(state_ref[1]),
                               rtol=1e-5, atol=1e-5)

    # Second forward() call reusing the persisted hidden state (module
    # semantics: self.hidden_state carried across calls).
    x2 = jax.random.normal(k_x2, (B, T, INPUT), jnp.float32)
    y2, _ = predictive_network_forward(x2, params, state)
    y2 = jax.block_until_ready(y2)
    y2_ref, _ = predictive_network_ref(x2, params, state_ref)
    np.testing.assert_allclose(np.asarray(y2), np.asarray(y2_ref),
                               rtol=1e-5, atol=1e-5)

    print("KERNEL_OK")
</pallas_src>

<mosaic_0001>
module attributes {stable_mosaic.version = 11 : i64} {
  func.func @_lstm_chunk_kernel(%arg0: i32, %arg1: memref<8x2x4xf32, #tpu.memory_space<vmem>>, %arg2: memref<4x128xf32, #tpu.memory_space<vmem>>, %arg3: memref<32x128xf32, #tpu.memory_space<vmem>>, %arg4: memref<1x128xf32, #tpu.memory_space<vmem>>, %arg5: memref<2x32xf32, #tpu.memory_space<vmem>>, %arg6: memref<2x32xf32, #tpu.memory_space<vmem>>, %arg7: memref<8x2x32xf32, #tpu.memory_space<vmem>>, %arg8: memref<2x32xf32, #tpu.memory_space<vmem>>, %arg9: memref<2x32xf32, #tpu.memory_space<vmem>>, %arg10: memref<2x32xf32, #tpu.memory_space<vmem>>, %arg11: memref<2x32xf32, #tpu.memory_space<vmem>>) attributes {dimension_semantics = [#tpu.dimension_semantics<arbitrary>], iteration_bounds = array<i64: 1>, scalar_prefetch = 0 : i64, scratch_operands = 2 : i64, tpu.core_type = #tpu.core_type<tc>, window_params = [{transform_indices = @transform_0, window_bounds = array<i64: 8, 2, 4>}, {pipeline_mode = #tpu.pipeline_mode<synchronous>, transform_indices = @transform_1, window_bounds = array<i64: 4, 128>}, {pipeline_mode = #tpu.pipeline_mode<synchronous>, transform_indices = @transform_2, window_bounds = array<i64: 32, 128>}, {pipeline_mode = #tpu.pipeline_mode<synchronous>, transform_indices = @transform_3, window_bounds = array<i64: 1, 128>}, {pipeline_mode = #tpu.pipeline_mode<synchronous>, transform_indices = @transform_4, window_bounds = array<i64: 2, 32>}, {pipeline_mode = #tpu.pipeline_mode<synchronous>, transform_indices = @transform_5, window_bounds = array<i64: 2, 32>}, {transform_indices = @transform_6, window_bounds = array<i64: 8, 2, 32>}, {pipeline_mode = #tpu.pipeline_mode<synchronous>, transform_indices = @transform_7, window_bounds = array<i64: 2, 32>}, {pipeline_mode = #tpu.pipeline_mode<synchronous>, transform_indices = @transform_8, window_bounds = array<i64: 2, 32>}]} {
    %c0_i32 = arith.constant 0 : i32
    %0 = arith.cmpi eq, %arg0, %c0_i32 : i32
    %1 = arith.extui %0 : i1 to i32
    %c0_i32_0 = arith.constant 0 : i32
    %2 = arith.cmpi ne, %1, %c0_i32_0 : i32
    scf.if %2 {
      %c0_80 = arith.constant 0 : index
      %c0_81 = arith.constant 0 : index
      %213 = vector.load %arg5[%c0_80, %c0_81] : memref<2x32xf32, #tpu.memory_space<vmem>>, vector<2x32xf32>
      %c0_82 = arith.constant 0 : index
      %c0_83 = arith.constant 0 : index
      %214 = vector.load %arg10[%c0_82, %c0_83] : memref<2x32xf32, #tpu.memory_space<vmem>>, vector<2x32xf32>
      tpu.vector_store %arg10[%c0_82, %c0_83], %213 {strides = array<i32>} : memref<2x32xf32, #tpu.memory_space<vmem>>, vector<2x32xf32>,
      %c0_84 = arith.constant 0 : index
      %c0_85 = arith.constant 0 : index
      %215 = vector.load %arg6[%c0_84, %c0_85] : memref<2x32xf32, #tpu.memory_space<vmem>>, vector<2x32xf32>
      %c0_86 = arith.constant 0 : index
      %c0_87 = arith.constant 0 : index
      %216 = vector.load %arg11[%c0_86, %c0_87] : memref<2x32xf32, #tpu.memory_space<vmem>>, vector<2x32xf32>
      tpu.vector_store %arg11[%c0_86, %c0_87], %215 {strides = array<i32>} : memref<2x32xf32, #tpu.memory_space<vmem>>, vector<2x32xf32>,
    } else {
    }
    %c0 = arith.constant 0 : index
    %c0_1 = arith.constant 0 : index
    %3 = vector.load %arg2[%c0, %c0_1] : memref<4x128xf32, #tpu.memory_space<vmem>>, vector<4x128xf32>
    %c0_2 = arith.constant 0 : index
    %c0_3 = arith.constant 0 : index
    %4 = vector.load %arg3[%c0_2, %c0_3] : memref<32x128xf32, #tpu.memory_space<vmem>>, vector<32x128xf32>
    %c0_4 = arith.constant 0 : index
    %c0_5 = arith.constant 0 : index
    %5 = vector.load %arg4[%c0_4, %c0_5] : memref<1x128xf32, #tpu.memory_space<vmem>>, vector<1x128xf32>
    %c0_6 = arith.constant 0 : index
    %c0_7 = arith.constant 0 : index
    %6 = vector.load %arg10[%c0_6, %c0_7] : memref<2x32xf32, #tpu.memory_space<vmem>>, vector<2x32xf32>
    %c0_8 = arith.constant 0 : index
    %c0_9 = arith.constant 0 : index
    %7 = vector.load %arg11[%c0_8, %c0_9] : memref<2x32xf32, #tpu.memory_space<vmem>>, vector<2x32xf32>
    %c0_10 = arith.constant 0 : index
    %c0_11 = arith.constant 0 : index
    %c0_12 = arith.constant 0 : index
    %8 = vector.load %arg1[%c0_10, %c0_11, %c0_12] : memref<8x2x4xf32, #tpu.memory_space<vmem>>, vector<1x2x4xf32>
    %9 = vector.shape_cast %8 : vector<1x2x4xf32> to vector<2x4xf32>
    %cst = arith.constant dense<0.000000e+00> : vector<2x128xf32>
    %10 = tpu.matmul %9, %3, %cst {dimension_numbers = #tpu.dot_dimension_numbers<[1], [0], [0], [1], [0, 0, 1, 1], [], []>} : vector<2x4xf32>, vector<4x128xf32>, vector<2x128xf32> -> vector<2x128xf32>
    %cst_13 = arith.constant dense<0.000000e+00> : vector<2x128xf32>
    %11 = tpu.matmul %6, %4, %cst_13 {dimension_numbers = #tpu.dot_dimension_numbers<[1], [0], [0], [1], [0, 0, 1, 1], [], []>} : vector<2x32xf32>, vector<32x128xf32>, vector<2x128xf32> -> vector<2x128xf32>
    %12 = arith.addf %10, %11 : vector<2x128xf32>
    %13 = vector.broadcast %5 : vector<1x128xf32> to vector<2x128xf32>
    %14 = arith.addf %12, %13 : vector<2x128xf32>
    %15 = arith.negf %14 : vector<2x128xf32>
    %16 = math.exp %15 : vector<2x128xf32>
    %cst_14 = arith.constant 1.000000e+00 : f32
    %17 = vector.broadcast %cst_14 : f32 to vector<2x128xf32>
    %18 = arith.addf %17, %16 : vector<2x128xf32>
    %19 = arith.divf %17, %18 : vector<2x128xf32>
    %20 = vector.extract_strided_slice %19 {offsets = [0, 0], sizes = [2, 32], strides = [1, 1]} : vector<2x128xf32> to vector<2x32xf32>
    %21 = vector.extract_strided_slice %19 {offsets = [0, 32], sizes = [2, 32], strides = [1, 1]} : vector<2x128xf32> to vector<2x32xf32>
    %22 = vector.extract_strided_slice %19 {offsets = [0, 96], sizes = [2, 32], strides = [1, 1]} : vector<2x128xf32> to vector<2x32xf32>
    %23 = vector.extract_strided_slice %14 {offsets = [0, 64], sizes = [2, 32], strides = [1, 1]} : vector<2x128xf32> to vector<2x32xf32>
    %24 = math.tanh %23 : vector<2x32xf32>
    %25 = arith.mulf %21, %7 : vector<2x32xf32>
    %26 = arith.mulf %20, %24 : vector<2x32xf32>
    %27 = arith.addf %25, %26 : vector<2x32xf32>
    %28 = math.tanh %27 : vector<2x32xf32>
    %29 = arith.mulf %22, %28 : vector<2x32xf32>
    %c0_15 = arith.constant 0 : index
    %c0_16 = arith.constant 0 : index
    %c0_17 = arith.constant 0 : index
    %30 = vector.load %arg7[%c0_15, %c0_16, %c0_17] : memref<8x2x32xf32, #tpu.memory_space<vmem>>, vector<1x2x32xf32>
    %31 = vector.shape_cast %30 : vector<1x2x32xf32> to vector<2x32xf32>
    %32 = vector.shape_cast %29 : vector<2x32xf32> to vector<1x2x32xf32>
    tpu.vector_store %arg7[%c0_15, %c0_16, %c0_17], %32 {strides = array<i32>} : memref<8x2x32xf32, #tpu.memory_space<vmem>>, vector<1x2x32xf32>,
    %c1 = arith.constant 1 : index
    %c0_18 = arith.constant 0 : index
    %c0_19 = arith.constant 0 : index
    %33 = vector.load %arg1[%c1, %c0_18, %c0_19] : memref<8x2x4xf32, #tpu.memory_space<vmem>>, vector<1x2x4xf32>
    %34 = vector.shape_cast %33 : vector<1x2x4xf32> to vector<2x4xf32>
    %cst_20 = arith.constant dense<0.000000e+00> : vector<2x128xf32>
    %35 = tpu.matmul %34, %3, %cst_20 {dimension_numbers = #tpu.dot_dimension_numbers<[1], [0], [0], [1], [0, 0, 1, 1], [], []>} : vector<2x4xf32>, vector<4x128xf32>, vector<2x128xf32> -> vector<2x128xf32>
    %cst_21 = arith.constant dense<0.000000e+00> : vector<2x128xf32>
    %36 = tpu.matmul %29, %4, %cst_21 {dimension_numbers = #tpu.dot_dimension_numbers<[1], [0], [0], [1], [0, 0, 1, 1], [], []>} : vector<2x32xf32>, vector<32x128xf32>, vector<2x128xf32> -> vector<2x128xf32>
    %37 = arith.addf %35, %36 : vector<2x128xf32>
    %38 = vector.broadcast %5 : vector<1x128xf32> to vector<2x128xf32>
    %39 = arith.addf %37, %38 : vector<2x128xf32>
    %40 = arith.negf %39 : vector<2x128xf32>
    %41 = math.exp %40 : vector<2x128xf32>
    %cst_22 = arith.constant 1.000000e+00 : f32
    %42 = vector.broadcast %cst_22 : f32 to vector<2x128xf32>
    %43 = arith.addf %42, %41 : vector<2x128xf32>
    %44 = arith.divf %42, %43 : vector<2x128xf32>
    %45 = vector.extract_strided_slice %44 {offsets = [0, 0], sizes = [2, 32], strides = [1, 1]} : vector<2x128xf32> to vector<2x32xf32>
    %46 = vector.extract_strided_slice %44 {offsets = [0, 32], sizes = [2, 32], strides = [1, 1]} : vector<2x128xf32> to vector<2x32xf32>
    %47 = vector.extract_strided_slice %44 {offsets = [0, 96], sizes = [2, 32], strides = [1, 1]} : vector<2x128xf32> to vector<2x32xf32>
    %48 = vector.extract_strided_slice %39 {offsets = [0, 64], sizes = [2, 32], strides = [1, 1]} : vector<2x128xf32> to vector<2x32xf32>
    %49 = math.tanh %48 : vector<2x32xf32>
    %50 = arith.mulf %46, %27 : vector<2x32xf32>
    %51 = arith.mulf %45, %49 : vector<2x32xf32>
    %52 = arith.addf %50, %51 : vector<2x32xf32>
    %53 = math.tanh %52 : vector<2x32xf32>
    %54 = arith.mulf %47, %53 : vector<2x32xf32>
    %c1_23 = arith.constant 1 : index
    %c0_24 = arith.constant 0 : index
    %c0_25 = arith.constant 0 : index
    %55 = vector.load %arg7[%c1_23, %c0_24, %c0_25] : memref<8x2x32xf32, #tpu.memory_space<vmem>>, vector<1x2x32xf32>
    %56 = vector.shape_cast %55 : vector<1x2x32xf32> to vector<2x32xf32>
    %57 = vector.shape_cast %54 : vector<2x32xf32> to vector<1x2x32xf32>
    tpu.vector_store %arg7[%c1_23, %c0_24, %c0_25], %57 {strides = array<i32>} : memref<8x2x32xf32, #tpu.memory_space<vmem>>, vector<1x2x32xf32>,
    %c2 = arith.constant 2 : index
    %c0_26 = arith.constant 0 : index
    %c0_27 = arith.constant 0 : index
    %58 = vector.load %arg1[%c2, %c0_26, %c0_27] : memref<8x2x4xf32, #tpu.memory_space<vmem>>, vector<1x2x4xf32>
    %59 = vector.shape_cast %58 : vector<1x2x4xf32> to vector<2x4xf32>
    %cst_28 = arith.constant dense<0.000000e+00> : vector<2x128xf32>
    %60 = tpu.matmul %59, %3, %cst_28 {dimension_numbers = #tpu.dot_dimension_numbers<[1], [0], [0], [1], [0, 0, 1, 1], [], []>} : vector<2x4xf32>, vector<4x128xf32>, vector<2x128xf32> -> vector<2x128xf32>
    %cst_29 = arith.constant dense<0.000000e+00> : vector<2x128xf32>
    %61 = tpu.matmul %54, %4, %cst_29 {dimension_numbers = #tpu.dot_dimension_numbers<[1], [0], [0], [1], [0, 0, 1, 1], [], []>} : vector<2x32xf32>, vector<32x128xf32>, vector<2x128xf32> -> vector<2x128xf32>
    %62 = arith.addf %60, %61 : vector<2x128xf32>
    %63 = vector.broadcast %5 : vector<1x128xf32> to vector<2x128xf32>
    %64 = arith.addf %62, %63 : vector<2x128xf32>
    %65 = arith.negf %64 : vector<2x128xf32>
    %66 = math.exp %65 : vector<2x128xf32>
    %cst_30 = arith.constant 1.000000e+00 : f32
    %67 = vector.broadcast %cst_30 : f32 to vector<2x128xf32>
    %68 = arith.addf %67, %66 : vector<2x128xf32>
    %69 = arith.divf %67, %68 : vector<2x128xf32>
    %70 = vector.extract_strided_slice %69 {offsets = [0, 0], sizes = [2, 32], strides = [1, 1]} : vector<2x128xf32> to vector<2x32xf32>
    %71 = vector.extract_strided_slice %69 {offsets = [0, 32], sizes = [2, 32], strides = [1, 1]} : vector<2x128xf32> to vector<2x32xf32>
    %72 = vector.extract_strided_slice %69 {offsets = [0, 96], sizes = [2, 32], strides = [1, 1]} : vector<2x128xf32> to vector<2x32xf32>
    %73 = vector.extract_strided_slice %64 {offsets = [0, 64], sizes = [2, 32], strides = [1, 1]} : vector<2x128xf32> to vector<2x32xf32>
    %74 = math.tanh %73 : vector<2x32xf32>
    %75 = arith.mulf %71, %52 : vector<2x32xf32>
    %76 = arith.mulf %70, %74 : vector<2x32xf32>
    %77 = arith.addf %75, %76 : vector<2x32xf32>
    %78 = math.tanh %77 : vector<2x32xf32>
    %79 = arith.mulf %72, %78 : vector<2x32xf32>
    %c2_31 = arith.constant 2 : index
    %c0_32 = arith.constant 0 : index
    %c0_33 = arith.constant 0 : index
    %80 = vector.load %arg7[%c2_31, %c0_32, %c0_33] : memref<8x2x32xf32, #tpu.memory_space<vmem>>, vector<1x2x32xf32>
    %81 = vector.shape_cast %80 : vector<1x2x32xf32> to vector<2x32xf32>
    %82 = vector.shape_cast %79 : vector<2x32xf32> to vector<1x2x32xf32>
    tpu.vector_store %arg7[%c2_31, %c0_32, %c0_33], %82 {strides = array<i32>} : memref<8x2x32xf32, #tpu.memory_space<vmem>>, vector<1x2x32xf32>,
    %c3 = arith.constant 3 : index
    %c0_34 = arith.constant 0 : index
    %c0_35 = arith.constant 0 : index
    %83 = vector.load %arg1[%c3, %c0_34, %c0_35] : memref<8x2x4xf32, #tpu.memory_space<vmem>>, vector<1x2x4xf32>
    %84 = vector.shape_cast %83 : vector<1x2x4xf32> to vector<2x4xf32>
    %cst_36 = arith.constant dense<0.000000e+00> : vector<2x128xf32>
    %85 = tpu.matmul %84, %3, %cst_36 {dimension_numbers = #tpu.dot_dimension_numbers<[1], [0], [0], [1], [0, 0, 1, 1], [], []>} : vector<2x4xf32>, vector<4x128xf32>, vector<2x128xf32> -> vector<2x128xf32>
    %cst_37 = arith.constant dense<0.000000e+00> : vector<2x128xf32>
    %86 = tpu.matmul %79, %4, %cst_37 {dimension_numbers = #tpu.dot_dimension_numbers<[1], [0], [0], [1], [0, 0, 1, 1], [], []>} : vector<2x32xf32>, vector<32x128xf32>, vector<2x128xf32> -> vector<2x128xf32>
    %87 = arith.addf %85, %86 : vector<2x128xf32>
    %88 = vector.broadcast %5 : vector<1x128xf32> to vector<2x128xf32>
    %89 = arith.addf %87, %88 : vector<2x128xf32>
    %90 = arith.negf %89 : vector<2x128xf32>
    %91 = math.exp %90 : vector<2x128xf32>
    %cst_38 = arith.constant 1.000000e+00 : f32
    %92 = vector.broadcast %cst_38 : f32 to vector<2x128xf32>
    %93 = arith.addf %92, %91 : vector<2x128xf32>
    %94 = arith.divf %92, %93 : vector<2x128xf32>
    %95 = vector.extract_strided_slice %94 {offsets = [0, 0], sizes = [2, 32], strides = [1, 1]} : vector<2x128xf32> to vector<2x32xf32>
    %96 = vector.extract_strided_slice %94 {offsets = [0, 32], sizes = [2, 32], strides = [1, 1]} : vector<2x128xf32> to vector<2x32xf32>
    %97 = vector.extract_strided_slice %94 {offsets = [0, 96], sizes = [2, 32], strides = [1, 1]} : vector<2x128xf32> to vector<2x32xf32>
    %98 = vector.extract_strided_slice %89 {offsets = [0, 64], sizes = [2, 32], strides = [1, 1]} : vector<2x128xf32> to vector<2x32xf32>
    %99 = math.tanh %98 : vector<2x32xf32>
    %100 = arith.mulf %96, %77 : vector<2x32xf32>
    %101 = arith.mulf %95, %99 : vector<2x32xf32>
    %102 = arith.addf %100, %101 : vector<2x32xf32>
    %103 = math.tanh %102 : vector<2x32xf32>
    %104 = arith.mulf %97, %103 : vector<2x32xf32>
    %c3_39 = arith.constant 3 : index
    %c0_40 = arith.constant 0 : index
    %c0_41 = arith.constant 0 : index
    %105 = vector.load %arg7[%c3_39, %c0_40, %c0_41] : memref<8x2x32xf32, #tpu.memory_space<vmem>>, vector<1x2x32xf32>
    %106 = vector.shape_cast %105 : vector<1x2x32xf32> to vector<2x32xf32>
    %107 = vector.shape_cast %104 : vector<2x32xf32> to vector<1x2x32xf32>
    tpu.vector_store %arg7[%c3_39, %c0_40, %c0_41], %107 {strides = array<i32>} : memref<8x2x32xf32, #tpu.memory_space<vmem>>, vector<1x2x32xf32>,
    %c4 = arith.constant 4 : index
    %c0_42 = arith.constant 0 : index
    %c0_43 = arith.constant 0 : index
    %108 = vector.load %arg1[%c4, %c0_42, %c0_43] : memref<8x2x4xf32, #tpu.memory_space<vmem>>, vector<1x2x4xf32>
    %109 = vector.shape_cast %108 : vector<1x2x4xf32> to vector<2x4xf32>
    %cst_44 = arith.constant dense<0.000000e+00> : vector<2x128xf32>
    %110 = tpu.matmul %109, %3, %cst_44 {dimension_numbers = #tpu.dot_dimension_numbers<[1], [0], [0], [1], [0, 0, 1, 1], [], []>} : vector<2x4xf32>, vector<4x128xf32>, vector<2x128xf32> -> vector<2x128xf32>
    %cst_45 = arith.constant dense<0.000000e+00> : vector<2x128xf32>
    %111 = tpu.matmul %104, %4, %cst_45 {dimension_numbers = #tpu.dot_dimension_numbers<[1], [0], [0], [1], [0, 0, 1, 1], [], []>} : vector<2x32xf32>, vector<32x128xf32>, vector<2x128xf32> -> vector<2x128xf32>
    %112 = arith.addf %110, %111 : vector<2x128xf32>
    %113 = vector.broadcast %5 : vector<1x128xf32> to vector<2x128xf32>
    %114 = arith.addf %112, %113 : vector<2x128xf32>
    %115 = arith.negf %114 : vector<2x128xf32>
    %116 = math.exp %115 : vector<2x128xf32>
    %cst_46 = arith.constant 1.000000e+00 : f32
    %117 = vector.broadcast %cst_46 : f32 to vector<2x128xf32>
    %118 = arith.addf %117, %116 : vector<2x128xf32>
    %119 = arith.divf %117, %118 : vector<2x128xf32>
    %120 = vector.extract_strided_slice %119 {offsets = [0, 0], sizes = [2, 32], strides = [1, 1]} : vector<2x128xf32> to vector<2x32xf32>
    %121 = vector.extract_strided_slice %119 {offsets = [0, 32], sizes = [2, 32], strides = [1, 1]} : vector<2x128xf32> to vector<2x32xf32>
    %122 = vector.extract_strided_slice %119 {offsets = [0, 96], sizes = [2, 32], strides = [1, 1]} : vector<2x128xf32> to vector<2x32xf32>
    %123 = vector.extract_strided_slice %114 {offsets = [0, 64], sizes = [2, 32], strides = [1, 1]} : vector<2x128xf32> to vector<2x32xf32>
    %124 = math.tanh %123 : vector<2x32xf32>
    %125 = arith.mulf %121, %102 : vector<2x32xf32>
    %126 = arith.mulf %120, %124 : vector<2x32xf32>
    %127 = arith.addf %125, %126 : vector<2x32xf32>
    %128 = math.tanh %127 : vector<2x32xf32>
    %129 = arith.mulf %122, %128 : vector<2x32xf32>
    %c4_47 = arith.constant 4 : index
    %c0_48 = arith.constant 0 : index
    %c0_49 = arith.constant 0 : index
    %130 = vector.load %arg7[%c4_47, %c0_48, %c0_49] : memref<8x2x32xf32, #tpu.memory_space<vmem>>, vector<1x2x32xf32>
    %131 = vector.shape_cast %130 : vector<1x2x32xf32> to vector<2x32xf32>
    %132 = vector.shape_cast %129 : vector<2x32xf32> to vector<1x2x32xf32>
    tpu.vector_store %arg7[%c4_47, %c0_48, %c0_49], %132 {strides = array<i32>} : memref<8x2x32xf32, #tpu.memory_space<vmem>>, vector<1x2x32xf32>,
    %c5 = arith.constant 5 : index
    %c0_50 = arith.constant 0 : index
    %c0_51 = arith.constant 0 : index
    %133 = vector.load %arg1[%c5, %c0_50, %c0_51] : memref<8x2x4xf32, #tpu.memory_space<vmem>>, vector<1x2x4xf32>
    %134 = vector.shape_cast %133 : vector<1x2x4xf32> to vector<2x4xf32>
    %cst_52 = arith.constant dense<0.000000e+00> : vector<2x128xf32>
    %135 = tpu.matmul %134, %3, %cst_52 {dimension_numbers = #tpu.dot_dimension_numbers<[1], [0], [0], [1], [0, 0, 1, 1], [], []>} : vector<2x4xf32>, vector<4x128xf32>, vector<2x128xf32> -> vector<2x128xf32>
    %cst_53 = arith.constant dense<0.000000e+00> : vector<2x128xf32>
    %136 = tpu.matmul %129, %4, %cst_53 {dimension_numbers = #tpu.dot_dimension_numbers<[1], [0], [0], [1], [0, 0, 1, 1], [], []>} : vector<2x32xf32>, vector<32x128xf32>, vector<2x128xf32> -> vector<2x128xf32>
    %137 = arith.addf %135, %136 : vector<2x128xf32>
    %138 = vector.broadcast %5 : vector<1x128xf32> to vector<2x128xf32>
    %139 = arith.addf %137, %138 : vector<2x128xf32>
    %140 = arith.negf %139 : vector<2x128xf32>
    %141 = math.exp %140 : vector<2x128xf32>
    %cst_54 = arith.constant 1.000000e+00 : f32
    %142 = vector.broadcast %cst_54 : f32 to vector<2x128xf32>
    %143 = arith.addf %142, %141 : vector<2x128xf32>
    %144 = arith.divf %142, %143 : vector<2x128xf32>
    %145 = vector.extract_strided_slice %144 {offsets = [0, 0], sizes = [2, 32], strides = [1, 1]} : vector<2x128xf32> to vector<2x32xf32>
    %146 = vector.extract_strided_slice %144 {offsets = [0, 32], sizes = [2, 32], strides = [1, 1]} : vector<2x128xf32> to vector<2x32xf32>
    %147 = vector.extract_strided_slice %144 {offsets = [0, 96], sizes = [2, 32], strides = [1, 1]} : vector<2x128xf32> to vector<2x32xf32>
    %148 = vector.extract_strided_slice %139 {offsets = [0, 64], sizes = [2, 32], strides = [1, 1]} : vector<2x128xf32> to vector<2x32xf32>
    %149 = math.tanh %148 : vector<2x32xf32>
    %150 = arith.mulf %146, %127 : vector<2x32xf32>
    %151 = arith.mulf %145, %149 : vector<2x32xf32>
    %152 = arith.addf %150, %151 : vector<2x32xf32>
    %153 = math.tanh %152 : vector<2x32xf32>
    %154 = arith.mulf %147, %153 : vector<2x32xf32>
    %c5_55 = arith.constant 5 : index
    %c0_56 = arith.constant 0 : index
    %c0_57 = arith.constant 0 : index
    %155 = vector.load %arg7[%c5_55, %c0_56, %c0_57] : memref<8x2x32xf32, #tpu.memory_space<vmem>>, vector<1x2x32xf32>
    %156 = vector.shape_cast %155 : vector<1x2x32xf32> to vector<2x32xf32>
    %157 = vector.shape_cast %154 : vector<2x32xf32> to vector<1x2x32xf32>
    tpu.vector_store %arg7[%c5_55, %c0_56, %c0_57], %157 {strides = array<i32>} : memref<8x2x32xf32, #tpu.memory_space<vmem>>, vector<1x2x32xf32>,
    %c6 = arith.constant 6 : index
    %c0_58 = arith.constant 0 : index
    %c0_59 = arith.constant 0 : index
    %158 = vector.load %arg1[%c6, %c0_58, %c0_59] : memref<8x2x4xf32, #tpu.memory_space<vmem>>, vector<1x2x4xf32>
    %159 = vector.shape_cast %158 : vector<1x2x4xf32> to vector<2x4xf32>
    %cst_60 = arith.constant dense<0.000000e+00> : vector<2x128xf32>
    %160 = tpu.matmul %159, %3, %cst_60 {dimension_numbers = #tpu.dot_dimension_numbers<[1], [0], [0], [1], [0, 0, 1, 1], [], []>} : vector<2x4xf32>, vector<4x128xf32>, vector<2x128xf32> -> vector<2x128xf32>
    %cst_61 = arith.constant dense<0.000000e+00> : vector<2x128xf32>
    %161 = tpu.matmul %154, %4, %cst_61 {dimension_numbers = #tpu.dot_dimension_numbers<[1], [0], [0], [1], [0, 0, 1, 1], [], []>} : vector<2x32xf32>, vector<32x128xf32>, vector<2x128xf32> -> vector<2x128xf32>
    %162 = arith.addf %160, %161 : vector<2x128xf32>
    %163 = vector.broadcast %5 : vector<1x128xf32> to vector<2x128xf32>
    %164 = arith.addf %162, %163 : vector<2x128xf32>
    %165 = arith.negf %164 : vector<2x128xf32>
    %166 = math.exp %165 : vector<2x128xf32>
    %cst_62 = arith.constant 1.000000e+00 : f32
    %167 = vector.broadcast %cst_62 : f32 to vector<2x128xf32>
    %168 = arith.addf %167, %166 : vector<2x128xf32>
    %169 = arith.divf %167, %168 : vector<2x128xf32>
    %170 = vector.extract_strided_slice %169 {offsets = [0, 0], sizes = [2, 32], strides = [1, 1]} : vector<2x128xf32> to vector<2x32xf32>
    %171 = vector.extract_strided_slice %169 {offsets = [0, 32], sizes = [2, 32], strides = [1, 1]} : vector<2x128xf32> to vector<2x32xf32>
    %172 = vector.extract_strided_slice %169 {offsets = [0, 96], sizes = [2, 32], strides = [1, 1]} : vector<2x128xf32> to vector<2x32xf32>
    %173 = vector.extract_strided_slice %164 {offsets = [0, 64], sizes = [2, 32], strides = [1, 1]} : vector<2x128xf32> to vector<2x32xf32>
    %174 = math.tanh %173 : vector<2x32xf32>
    %175 = arith.mulf %171, %152 : vector<2x32xf32>
    %176 = arith.mulf %170, %174 : vector<2x32xf32>
    %177 = arith.addf %175, %176 : vector<2x32xf32>
    %178 = math.tanh %177 : vector<2x32xf32>
    %179 = arith.mulf %172, %178 : vector<2x32xf32>
    %c6_63 = arith.constant 6 : index
    %c0_64 = arith.constant 0 : index
    %c0_65 = arith.constant 0 : index
    %180 = vector.load %arg7[%c6_63, %c0_64, %c0_65] : memref<8x2x32xf32, #tpu.memory_space<vmem>>, vector<1x2x32xf32>
    %181 = vector.shape_cast %180 : vector<1x2x32xf32> to vector<2x32xf32>
    %182 = vector.shape_cast %179 : vector<2x32xf32> to vector<1x2x32xf32>
    tpu.vector_store %arg7[%c6_63, %c0_64, %c0_65], %182 {strides = array<i32>} : memref<8x2x32xf32, #tpu.memory_space<vmem>>, vector<1x2x32xf32>,
    %c7 = arith.constant 7 : index
    %c0_66 = arith.constant 0 : index
    %c0_67 = arith.constant 0 : index
    %183 = vector.load %arg1[%c7, %c0_66, %c0_67] : memref<8x2x4xf32, #tpu.memory_space<vmem>>, vector<1x2x4xf32>
    %184 = vector.shape_cast %183 : vector<1x2x4xf32> to vector<2x4xf32>
    %cst_68 = arith.constant dense<0.000000e+00> : vector<2x128xf32>
    %185 = tpu.matmul %184, %3, %cst_68 {dimension_numbers = #tpu.dot_dimension_numbers<[1], [0], [0], [1], [0, 0, 1, 1], [], []>} : vector<2x4xf32>, vector<4x128xf32>, vector<2x128xf32> -> vector<2x128xf32>
    %cst_69 = arith.constant dense<0.000000e+00> : vector<2x128xf32>
    %186 = tpu.matmul %179, %4, %cst_69 {dimension_numbers = #tpu.dot_dimension_numbers<[1], [0], [0], [1], [0, 0, 1, 1], [], []>} : vector<2x32xf32>, vector<32x128xf32>, vector<2x128xf32> -> vector<2x128xf32>
    %187 = arith.addf %185, %186 : vector<2x128xf32>
    %188 = vector.broadcast %5 : vector<1x128xf32> to vector<2x128xf32>
    %189 = arith.addf %187, %188 : vector<2x128xf32>
    %190 = arith.negf %189 : vector<2x128xf32>
    %191 = math.exp %190 : vector<2x128xf32>
    %cst_70 = arith.constant 1.000000e+00 : f32
    %192 = vector.broadcast %cst_70 : f32 to vector<2x128xf32>
    %193 = arith.addf %192, %191 : vector<2x128xf32>
    %194 = arith.divf %192, %193 : vector<2x128xf32>
    %195 = vector.extract_strided_slice %194 {offsets = [0, 0], sizes = [2, 32], strides = [1, 1]} : vector<2x128xf32> to vector<2x32xf32>
    %196 = vector.extract_strided_slice %194 {offsets = [0, 32], sizes = [2, 32], strides = [1, 1]} : vector<2x128xf32> to vector<2x32xf32>
    %197 = vector.extract_strided_slice %194 {offsets = [0, 96], sizes = [2, 32], strides = [1, 1]} : vector<2x128xf32> to vector<2x32xf32>
    %198 = vector.extract_strided_slice %189 {offsets = [0, 64], sizes = [2, 32], strides = [1, 1]} : vector<2x128xf32> to vector<2x32xf32>
    %199 = math.tanh %198 : vector<2x32xf32>
    %200 = arith.mulf %196, %177 : vector<2x32xf32>
    %201 = arith.mulf %195, %199 : vector<2x32xf32>
    %202 = arith.addf %200, %201 : vector<2x32xf32>
    %203 = math.tanh %202 : vector<2x32xf32>
    %204 = arith.mulf %197, %203 : vector<2x32xf32>
    %c7_71 = arith.constant 7 : index
    %c0_72 = arith.constant 0 : index
    %c0_73 = arith.constant 0 : index
    %205 = vector.load %arg7[%c7_71, %c0_72, %c0_73] : memref<8x2x32xf32, #tpu.memory_space<vmem>>, vector<1x2x32xf32>
    %206 = vector.shape_cast %205 : vector<1x2x32xf32> to vector<2x32xf32>
    %207 = vector.shape_cast %204 : vector<2x32xf32> to vector<1x2x32xf32>
    tpu.vector_store %arg7[%c7_71, %c0_72, %c0_73], %207 {strides = array<i32>} : memref<8x2x32xf32, #tpu.memory_space<vmem>>, vector<1x2x32xf32>,
    %c0_74 = arith.constant 0 : index
    %c0_75 = arith.constant 0 : index
    %208 = vector.load %arg10[%c0_74, %c0_75] : memref<2x32xf32, #tpu.memory_space<vmem>>, vector<2x32xf32>
    tpu.vector_store %arg10[%c0_74, %c0_75], %204 {strides = array<i32>} : memref<2x32xf32, #tpu.memory_space<vmem>>, vector<2x32xf32>,
    %c0_76 = arith.constant 0 : index
    %c0_77 = arith.constant 0 : index
    %209 = vector.load %arg11[%c0_76, %c0_77] : memref<2x32xf32, #tpu.memory_space<vmem>>, vector<2x32xf32>
    tpu.vector_store %arg11[%c0_76, %c0_77], %202 {strides = array<i32>} : memref<2x32xf32, #tpu.memory_space<vmem>>, vector<2x32xf32>,
    %c0_i32_78 = arith.constant 0 : i32
    %210 = arith.cmpi eq, %arg0, %c0_i32_78 : i32
    %211 = arith.extui %210 : i1 to i32
    %c0_i32_79 = arith.constant 0 : i32
    %212 = arith.cmpi ne, %211, %c0_i32_79 : i32
    scf.if %212 {
      %c0_80 = arith.constant 0 : index
      %c0_81 = arith.constant 0 : index
      %213 = vector.load %arg8[%c0_80, %c0_81] : memref<2x32xf32, #tpu.memory_space<vmem>>, vector<2x32xf32>
      tpu.vector_store %arg8[%c0_80, %c0_81], %204 {strides = array<i32>} : memref<2x32xf32, #tpu.memory_space<vmem>>, vector<2x32xf32>,
      %c0_82 = arith.constant 0 : index
      %c0_83 = arith.constant 0 : index
      %214 = vector.load %arg9[%c0_82, %c0_83] : memref<2x32xf32, #tpu.memory_space<vmem>>, vector<2x32xf32>
      tpu.vector_store %arg9[%c0_82, %c0_83], %202 {strides = array<i32>} : memref<2x32xf32, #tpu.memory_space<vmem>>, vector<2x32xf32>,
    } else {
    }
    return
  }
  func.func @transform_0(%arg0: i32) -> (i32, i32, i32) {
    %c0_i32 = arith.constant 0 : i32
    %c0_i32_0 = arith.constant 0 : i32
    %c0_i32_1 = arith.constant 0 : i32
    return %arg0, %c0_i32, %c0_i32_0 : i32, i32, i32
  }
  func.func @transform_1(%arg0: i32) -> (i32, i32) {
    %c0_i32 = arith.constant 0 : i32
    %c0_i32_0 = arith.constant 0 : i32
    %c0_i32_1 = arith.constant 0 : i32
    return %c0_i32, %c0_i32_0 : i32, i32
  }
  func.func @transform_2(%arg0: i32) -> (i32, i32) {
    %c0_i32 = arith.constant 0 : i32
    %c0_i32_0 = arith.constant 0 : i32
    %c0_i32_1 = arith.constant 0 : i32
    return %c0_i32, %c0_i32_0 : i32, i32
  }
  func.func @transform_3(%arg0: i32) -> (i32, i32) {
    %c0_i32 = arith.constant 0 : i32
    %c0_i32_0 = arith.constant 0 : i32
    %c0_i32_1 = arith.constant 0 : i32
    return %c0_i32, %c0_i32_0 : i32, i32
  }
  func.func @transform_4(%arg0: i32) -> (i32, i32) {
    %c0_i32 = arith.constant 0 : i32
    %c0_i32_0 = arith.constant 0 : i32
    %c0_i32_1 = arith.constant 0 : i32
    return %c0_i32, %c0_i32_0 : i32, i32
  }
  func.func @transform_5(%arg0: i32) -> (i32, i32) {
    %c0_i32 = arith.constant 0 : i32
    %c0_i32_0 = arith.constant 0 : i32
    %c0_i32_1 = arith.constant 0 : i32
    return %c0_i32, %c0_i32_0 : i32, i32
  }
  func.func @transform_6(%arg0: i32) -> (i32, i32, i32) {
    %c0_i32 = arith.constant 0 : i32
    %c0_i32_0 = arith.constant 0 : i32
    %c0_i32_1 = arith.constant 0 : i32
    return %arg0, %c0_i32, %c0_i32_0 : i32, i32, i32
  }
  func.func @transform_7(%arg0: i32) -> (i32, i32) {
    %c0_i32 = arith.constant 0 : i32
    %c0_i32_0 = arith.constant 0 : i32
    %c0_i32_1 = arith.constant 0 : i32
    return %c0_i32, %c0_i32_0 : i32, i32
  }
  func.func @transform_8(%arg0: i32) -> (i32, i32) {
    %c0_i32 = arith.constant 0 : i32
    %c0_i32_0 = arith.constant 0 : i32
    %c0_i32_1 = arith.constant 0 : i32
    return %c0_i32, %c0_i32_0 : i32, i32
  }
}

</mosaic_0001>

<bundles_post_ra>
// kernel: tpu_custom_call.1
= control target key start
LH: loop header
LB: loop body
LE: loop exit
PB: predicated region body
PF: predicated region fallthrough
CT: control target
= control target key end

     0   :  { %14 = vsyncpa [#allocation5], 0  ;;  %s1315_s0 = inlined_call_operand.vmem [shape: f32[8,2,4], index: 0, kind: input, shape index: {}]   ;;  %s1316_s1 = inlined_call_operand.vmem [shape: f32[4,128], index: 1, kind: input, shape index: {}]   ;;  %s1317_s2 = inlined_call_operand.hbm [shape: f32[32,128], index: 2, kind: input, shape index: {}]   ;;  %s1318_s3 = inlined_call_operand.vmem [shape: f32[1,128], index: 3, kind: input, shape index: {}]   ;;  %s1319_s4 = inlined_call_operand.vmem [shape: f32[2,32], index: 4, kind: input, shape index: {}]   ;;  %s1320_s5 = inlined_call_operand.vmem [shape: f32[2,32], index: 5, kind: input, shape index: {}]   ;;  %s1321_s6 = inlined_call_operand.hbm [shape: f32[8,2,32], index: 6, kind: output, shape index: {0}]   ;;  %s1322_s7 = inlined_call_operand.hbm [shape: f32[2,32], index: 7, kind: output, shape index: {1}]   ;;  %s1323_s8 = inlined_call_operand.hbm [shape: f32[2,32], index: 8, kind: output, shape index: {2}]  }
   0x1   :  { %15 = vsyncpa [#allocation6], 0 }
   0x2   :  { %16 = vsyncpa [#allocation9], 0  ;;  %s25_s29 = sshll.u32 %s1317_s2, 4  ;;  %s1079_s30 = smov [#allocation4]   ;;  %s26_s29 = int_to_ptr.hbm [resolvable:$true] %s25_s29 }
   0x3   :  { %s27_s9 = sshll.u32 %s1079_s30, 4  ;;  %s1080_s10 = smov 128   ;;  %s28_s9 = int_to_ptr.vmem [resolvable:$true] %s27_s9 }
   0x4   :  { %s1081_s11 = smov 8  }
   0x5   :  { %33 = dma.hbm_to_vmem [thread:$0]  %s26_s29, 512, %s28_s9, [#allocation5], %s1080_s10, %s1080_s10, %s1081_s11  }
   0x6   :  { %1073 = dma.done.wait [#allocation5], 512  }
   0x7   :  { %1074 = vsyncadd [#allocation5], 4294966784  ;;  %vm90_vm0 = vcmask 1043456   ;;  %vm49_vm1 = vcmask 254976   ;;  %v1137_v0 = vld [vmem:[#allocation4 + $0x18] sm:$0xff]  ;;  %v1139_v1 = vld [vmem:[#allocation4 + $0x10] sm:$0xff] }
   0x8   :  { %vm86_vm2 = vcmask 31744   ;;  %78 = vmatpush.msra.mxu0 %v1137_v0  ;;  %v1142_v2 = vld [vmem:[#allocation4 + $0x8] sm:$0xff]  ;;  %v1147_v3 = vld [vmem:[%s1316_s1] sm:$0xf]  ;;  %181 = vmatpush.msra.mxu2 %v1137_v0  ;;  %v1163_v6 = vld [vmem:[#allocation4] sm:$0xff]  ;;  %vm62_vm3 = vcmask 261120  }
   0x9   :  { %v48_v4 = vld [vmem:[%s1319_s4] sm:$0x3]  ;;  %864 = vmatpush.msk.msra.mxu1 %vm90_vm0, %v1147_v3  ;;  %869 = vmatpush.msk.msra.mxu3 %vm90_vm0, %v1147_v3  ;;  %s1082_s19 = smov 64   ;;  %s1083_s20 = smov 32   ;;  %v867_v38 = vld [vmem:[%s1315_s0 + $0x2] sm:$0x3] }
   0xa   :  { %50 = vst.msk [vmem:[#allocation2] sm:$0x3] %vm49_vm1, %v48_v4  ;;  %v61_v5 = vld [vmem:[%s1315_s0] sm:$0x3]  ;;  %79 = vmatpush.msra.mxu0 %v1139_v1  ;;  %182 = vmatpush.msra.mxu2 %v1139_v1  ;;  %v872_v4 = vld [vmem:[%s1315_s0 + $0x4] sm:$0x3] }
   0xb   :  { %865 = vmatmul.msk.f32.vlgmr.msra.gmra.mxu1 %vm86_vm2, %v61_v5  ;;  %874 = vmatpush.msk.msrb.mxu3 %vm90_vm0, %v1147_v3  ;;  %v51_v8 = vld [vmem:[%s1320_s5] sm:$0x3]  ;;  %s819_s12 = sshll.u32 %s1321_s6, 4  ;;  %s1085_s13 = smov [#allocation8]   ;;  %s820_s12 = int_to_ptr.hbm [resolvable:$true] %s819_s12 }
   0xc   :  { %80 = vmatpush.msra.mxu0 %v1142_v2  ;;  %272 = vmatpush.msrb.mxu1 %v1137_v0  ;;  %52 = vst.msk [vmem:[#allocation3] sm:$0x3] %vm49_vm1, %v51_v8  ;;  %v1198_v10 = vld [vmem:[%s1318_s3] ss:$0 sm:$0xff]  ;;  %s831_s14 = sshll.u32 %s1085_s13, 4  ;;  %s1086_s15 = smov [#allocation7]   ;;  %s832_s14 = int_to_ptr.vmem [resolvable:$true] %s831_s14 }
   0xd   :  { %183 = vmatpush.msra.mxu2 %v1142_v2  ;;  %870 = vmatmul.msk.f32.vlgmr.msra.gmra.mxu3 %vm86_vm2, %v867_v38  ;;  %s817_s16 = sshll.u32 %s1086_s15, 4  ;;  %s833_s17 = sshll.u32 %s1322_s7, 4  ;;  %s818_s16 = int_to_ptr.vmem [resolvable:$true] %s817_s16  ;;  %s834_s17 = int_to_ptr.hbm [resolvable:$true] %s833_s17 }
   0xe   :  { %81 = vmatpush.msra.mxu0 %v1163_v6  ;;  %273 = vmatpush.msrb.mxu1 %v1139_v1  ;;  %s1087_s18 = smov [#allocation10]   ;;  %s844_s21 = sshll.u32 %s1323_s8, 4  ;;  %s845_s21 = int_to_ptr.hbm [resolvable:$true] %s844_s21 }
   0xf   :  { %184 = vmatpush.msra.mxu2 %v1163_v6  ;;  %884 = vmatpush.msk.msra.mxu3 %vm90_vm0, %v1147_v3  ;;  %s1088_s6 = smov 2  }
  0x10   :  { %363 = vmatpush.msrb.mxu0 %v1137_v0  ;;  %274 = vmatpush.msrb.mxu1 %v1142_v2 }
  0x11   :  { %v59_v7 = vld [vmem:[#allocation2] sm:$0x3]  ;;  %879 = vmatpush.msk.msrb.mxu2 %vm90_vm0, %v1147_v3 }
  0x12   :  { %863 = vmatmul.msk.f32.vlgmr.msra.gmra.mxu0 %vm62_vm3, %v59_v7  ;;  %275 = vmatpush.msrb.mxu1 %v1163_v6 }
  0x13   :  { %364 = vmatpush.msrb.mxu0 %v1139_v1  ;;  %v60_v15 = vld [vmem:[#allocation3] sm:$0x3] }
  0x14   :  { %454 = vmatpush.msra.mxu1 %v1137_v0 }
  0x15   :  { %365 = vmatpush.msrb.mxu0 %v1142_v2  ;;  %875 = vmatmul.msk.f32.vlgmr.msrb.gmra.mxu3 %vm86_vm2, %v872_v4 }
  0x16   :  { %455 = vmatpush.msra.mxu1 %v1139_v1  ;;  %894 = vmatpush.msk.msrb.mxu3 %vm90_vm0, %v1147_v3 }
  0x17   :  { %366 = vmatpush.msrb.mxu0 %v1163_v6 }
  0x18   :  { %456 = vmatpush.msra.mxu1 %v1142_v2 }
  0x19   :  { %545 = vmatpush.msra.mxu0 %v1137_v0 }
  0x1a   :  { %457 = vmatpush.msra.mxu1 %v1163_v6 }
  0x1b   :  { %546 = vmatpush.msra.mxu0 %v1139_v1 }
  0x1d   :  { %547 = vmatpush.msra.mxu0 %v1142_v2 }
  0x1f   :  { %548 = vmatpush.msra.mxu0 %v1163_v6 }
  0x88   :  { %v111_v9 = vpop.f32.mrf.mxu1 }
  0x8f   :  { %v83_v11 = vpop.f32.mrf.mxu0 }
  0x90   :  { %v112_v12 = vadd.f32 %v111_v9, %v83_v11  ;;  %v209_v40 = vpop.f32.mrf.mxu3 }
  0x92   :  { %v117_v13 = vadd.f32 %v1198_v10, %v112_v12 }
  0x94   :  { %913 = vtanh.f32 %v117_v13  ;;  %v866_v16 = vmul.f32 -1.442695, %v117_v13 }
  0x96   :  { %915 = vpow2.f32 %v866_v16 }
  0x98   :  { %v300_v9 = vpop.f32.mrf.mxu3 }
  0x9a   :  { %v914_v14 = vpop.eup %913 }
  0x9b   :  { %144 = vrot.lane.b32.xlu0 %v914_v14, %s1082_s19 }
  0x9c   :  { %v916_v17 = vpop.eup %915 }
  0x9d   :  { %v121_v18 = vadd.f32 1.0, %v916_v17 }
  0x9f   :  { %917 = vrcp.f32 %v121_v18  ;;  %v133_v24 = vand.u32 2147483648, %v121_v18  ;;  %vm127_vm5 = vweird.f32 %v121_v18  ;;  %v131_v25 = vand.u32 2147483647, %v121_v18 }
  0xa1   :  { %v134_v27 = vor.u32 1.1754944e-38, %v133_v24  ;;  %vm132_vm7 = vcmp.eq.f32.partialorder %v131_v25, 8.507059e+37 }
  0xa3   :  { %139 = vrot.lane.b32.xlu0 %v60_v15, %s1083_s20 }
  0xa5   :  { %v918_v19 = vpop.eup %917 }
  0xa6   :  { %v123_v20 = vmul.f32 %v918_v19, %v121_v18  ;;  %vm128_vm4 = vweird.f32 %v918_v19 }
  0xa7   :  { %vm129_vm6 = vmor %vm127_vm5, %vm128_vm4 }
  0xa8   :  { %v124_v21 = vsub.f32 1.0, %v123_v20 }
  0xaa   :  { %v125_v22 = vmul.f32 %v918_v19, %v124_v21 }
  0xac   :  { %v126_v23 = vadd.f32 %v918_v19, %v125_v22 }
  0xae   :  { %v130_v26 = vsel %vm129_vm6, %v918_v19, %v126_v23 }
  0xaf   :  { %v135_v29 = vsel %vm132_vm7, %v134_v27, %v130_v26 }
 0x10d   :  { %v145_v28 = vpop.permute.xlu0 %144 }
 0x10e   :  { %v147_v30 = vmul.f32 %v145_v28, %v135_v29 }
 0x110   :  { %149 = vrot.lane.b32.xlu1 %v147_v30, %s1083_s20 }
 0x115   :  { %v140_v31 = vpop.permute.xlu0 %139 }
 0x116   :  { %v142_v32 = vmul.f32 %v140_v31, %v135_v29 }
 0x182   :  { %v150_v33 = vpop.permute.xlu1 %149 }
 0x183   :  { %v152_v34 = vadd.f32 %v150_v33, %v142_v32 }
 0x185   :  { %919 = vtanh.f32 %v152_v34 }
 0x18b   :  { %v920_v35 = vpop.eup %919 }
 0x18c   :  { %155 = vrot.lane.b32.xlu1 %v920_v35, %s1082_s19 }
 0x1fe   :  { %v156_v36 = vpop.permute.xlu1 %155 }
 0x1ff   :  { %v158_v37 = vmul.f32 %v156_v36, %v135_v29 }
 0x201   :  { %160 = vrot.lane.b32.xlu2 %v158_v37, %s1083_s20 }
 0x25b   :  { %v161_v39 = vpop.permute.xlu2 %160 }
 0x25c   :  { %164 = vst.msk [vmem:[#allocation7] sm:$0x3] %vm49_vm1, %v161_v39  ;;  %868 = vmatmul.msk.f32.vlgmr.msra.gmra.mxu2 %vm62_vm3, %v161_v39 }
 0x25d   :  { %889 = vmatpush.msk.msra.mxu2 %vm90_vm0, %v1147_v3 }
 0x2df   :  { %v186_v41 = vpop.f32.mrf.mxu2 }
 0x2e0   :  { %v210_v42 = vadd.f32 %v209_v40, %v186_v41 }
 0x2e2   :  { %v212_v43 = vadd.f32 %v1198_v10, %v210_v42 }
 0x2e4   :  { %921 = vtanh.f32 %v212_v43  ;;  %v871_v45 = vmul.f32 -1.442695, %v212_v43 }
 0x2e6   :  { %923 = vpow2.f32 %v871_v45 }
 0x2ea   :  { %v922_v44 = vpop.eup %921 }
 0x2eb   :  { %235 = vrot.lane.b32.xlu2 %v922_v44, %s1082_s19 }
 0x2ec   :  { %v924_v46 = vpop.eup %923 }
 0x2ed   :  { %v216_v47 = vadd.f32 1.0, %v924_v46 }
 0x2ef   :  { %925 = vrcp.f32 %v216_v47  ;;  %v228_v53 = vand.u32 2147483648, %v216_v47  ;;  %vm222_vm9 = vweird.f32 %v216_v47  ;;  %v226_v54 = vand.u32 2147483647, %v216_v47 }
 0x2f1   :  { %v229_v56 = vor.u32 1.1754944e-38, %v228_v53  ;;  %vm227_vm11 = vcmp.eq.f32.partialorder %v226_v54, 8.507059e+37 }
 0x2f5   :  { %v926_v48 = vpop.eup %925 }
 0x2f6   :  { %v218_v49 = vmul.f32 %v926_v48, %v216_v47  ;;  %vm223_vm8 = vweird.f32 %v926_v48 }
 0x2f7   :  { %vm224_vm10 = vmor %vm222_vm9, %vm223_vm8 }
 0x2f8   :  { %v219_v50 = vsub.f32 1.0, %v218_v49 }
 0x2fa   :  { %v220_v51 = vmul.f32 %v926_v48, %v219_v50 }
 0x2fc   :  { %v221_v52 = vadd.f32 %v926_v48, %v220_v51 }
 0x2fe   :  { %v225_v55 = vsel %vm224_vm10, %v926_v48, %v221_v52 }
 0x2ff   :  { %v230_v58 = vsel %vm227_vm11, %v229_v56, %v225_v55 }
 0x300   :  { %v233_v60 = vmul.f32 %v230_v58, %v152_v34  ;;  %v877_v34 = vld [vmem:[%s1315_s0 + $0x6] sm:$0x3] }
 0x301   :  { %880 = vmatmul.msk.f32.vlgmr.msrb.gmra.mxu2 %vm86_vm2, %v877_v34 }
 0x302   :  { %899 = vmatpush.msk.msrb.mxu2 %vm90_vm0, %v1147_v3 }
 0x345   :  { %v236_v57 = vpop.permute.xlu2 %235 }
 0x346   :  { %v238_v59 = vmul.f32 %v236_v57, %v230_v58  ;;  %v882_v57 = vld [vmem:[%s1315_s0 + $0x8] sm:$0x3] }
 0x347   :  { %885 = vmatmul.msk.f32.vlgmr.msra.gmra.mxu3 %vm86_vm2, %v882_v57 }
 0x348   :  { %240 = vrot.lane.b32.xlu0 %v238_v59, %s1083_s20 }
 0x384   :  { %v391_v38 = vpop.f32.mrf.mxu2 }
 0x3ba   :  { %v241_v61 = vpop.permute.xlu0 %240 }
 0x3bb   :  { %v243_v62 = vadd.f32 %v241_v61, %v233_v60 }
 0x3bd   :  { %927 = vtanh.f32 %v243_v62 }
 0x3c3   :  { %v928_v63 = vpop.eup %927 }
 0x3c4   :  { %246 = vrot.lane.b32.xlu1 %v928_v63, %s1082_s19 }
 0x3ca   :  { %v482_v61 = vpop.f32.mrf.mxu3 }
 0x436   :  { %v247_v5 = vpop.permute.xlu1 %246 }
 0x437   :  { %v249_v7 = vmul.f32 %v247_v5, %v230_v58 }
 0x439   :  { %251 = vrot.lane.b32.xlu2 %v249_v7, %s1083_s20 }
 0x493   :  { %v252_v8 = vpop.permute.xlu2 %251 }
 0x494   :  { %255 = vst.msk [vmem:[#allocation7 + $0x2] sm:$0x3] %vm49_vm1, %v252_v8  ;;  %873 = vmatmul.msk.f32.vlgmr.msrb.gmra.mxu1 %vm62_vm3, %v252_v8 }
 0x495   :  { %636 = vmatpush.msrb.mxu1 %v1137_v0 }
 0x497   :  { %637 = vmatpush.msrb.mxu1 %v1139_v1 }
 0x499   :  { %638 = vmatpush.msrb.mxu1 %v1142_v2 }
 0x49b   :  { %639 = vmatpush.msrb.mxu1 %v1163_v6 }
 0x511   :  { %v277_v11 = vpop.f32.mrf.mxu1 }
 0x512   :  { %v301_v12 = vadd.f32 %v300_v9, %v277_v11 }
 0x514   :  { %v303_v13 = vadd.f32 %v1198_v10, %v301_v12 }
 0x516   :  { %929 = vtanh.f32 %v303_v13  ;;  %v876_v15 = vmul.f32 -1.442695, %v303_v13 }
 0x518   :  { %931 = vpow2.f32 %v876_v15 }
 0x51c   :  { %v930_v14 = vpop.eup %929 }
 0x51d   :  { %326 = vrot.lane.b32.xlu0 %v930_v14, %s1082_s19 }
 0x51e   :  { %v932_v16 = vpop.eup %931 }
 0x51f   :  { %v307_v17 = vadd.f32 1.0, %v932_v16 }
 0x521   :  { %933 = vrcp.f32 %v307_v17  ;;  %v319_v23 = vand.u32 2147483648, %v307_v17  ;;  %vm313_vm13 = vweird.f32 %v307_v17  ;;  %v317_v24 = vand.u32 2147483647, %v307_v17 }
 0x523   :  { %v320_v26 = vor.u32 1.1754944e-38, %v319_v23  ;;  %vm318_vm15 = vcmp.eq.f32.partialorder %v317_v24, 8.507059e+37 }
 0x527   :  { %v934_v18 = vpop.eup %933 }
 0x528   :  { %v309_v19 = vmul.f32 %v934_v18, %v307_v17  ;;  %vm314_vm12 = vweird.f32 %v934_v18 }
 0x529   :  { %vm315_vm14 = vmor %vm313_vm13, %vm314_vm12 }
 0x52a   :  { %v310_v20 = vsub.f32 1.0, %v309_v19 }
 0x52c   :  { %v311_v21 = vmul.f32 %v934_v18, %v310_v20 }
 0x52e   :  { %v312_v22 = vadd.f32 %v934_v18, %v311_v21 }
 0x530   :  { %v316_v25 = vsel %vm315_vm14, %v934_v18, %v312_v22 }
 0x531   :  { %v321_v28 = vsel %vm318_vm15, %v320_v26, %v316_v25 }
 0x532   :  { %v324_v30 = vmul.f32 %v321_v28, %v243_v62 }
 0x58f   :  { %v327_v27 = vpop.permute.xlu0 %326 }
 0x590   :  { %v329_v29 = vmul.f32 %v327_v27, %v321_v28  ;;  %v887_v27 = vld [vmem:[%s1315_s0 + $0xa] sm:$0x3] }
 0x591   :  { %890 = vmatmul.msk.f32.vlgmr.msra.gmra.mxu2 %vm86_vm2, %v887_v27 }
 0x592   :  { %331 = vrot.lane.b32.xlu1 %v329_v29, %s1083_s20 }
 0x604   :  { %v332_v31 = vpop.permute.xlu1 %331 }
 0x605   :  { %v334_v32 = vadd.f32 %v332_v31, %v324_v30 }
 0x607   :  { %935 = vtanh.f32 %v334_v32 }
 0x60d   :  { %v936_v33 = vpop.eup %935 }
 0x60e   :  { %337 = vrot.lane.b32.xlu2 %v936_v33, %s1082_s19 }
 0x614   :  { %v573_v31 = vpop.f32.mrf.mxu2 }
 0x668   :  { %v338_v35 = vpop.permute.xlu2 %337 }
 0x669   :  { %v340_v36 = vmul.f32 %v338_v35, %v321_v28 }
 0x66b   :  { %342 = vrot.lane.b32.xlu0 %v340_v36, %s1083_s20 }
 0x6dd   :  { %v343_v37 = vpop.permute.xlu0 %342 }
 0x6de   :  { %346 = vst.msk [vmem:[#allocation7 + $0x4] sm:$0x3] %vm49_vm1, %v343_v37  ;;  %878 = vmatmul.msk.f32.vlgmr.msrb.gmra.mxu0 %vm62_vm3, %v343_v37 }
 0x6df   :  { %727 = vmatpush.msrb.mxu0 %v1137_v0 }
 0x6e1   :  { %728 = vmatpush.msrb.mxu0 %v1139_v1 }
 0x6e3   :  { %729 = vmatpush.msrb.mxu0 %v1142_v2 }
 0x6e5   :  { %730 = vmatpush.msrb.mxu0 %v1163_v6 }
 0x75b   :  { %v368_v39 = vpop.f32.mrf.mxu0 }
 0x75c   :  { %v392_v3 = vadd.f32 %v391_v38, %v368_v39 }
 0x75e   :  { %v394_v40 = vadd.f32 %v1198_v10, %v392_v3 }
 0x760   :  { %937 = vtanh.f32 %v394_v40  ;;  %v881_v42 = vmul.f32 -1.442695, %v394_v40 }
 0x762   :  { %939 = vpow2.f32 %v881_v42 }
 0x766   :  { %v938_v41 = vpop.eup %937 }
 0x767   :  { %417 = vrot.lane.b32.xlu1 %v938_v41, %s1082_s19 }
 0x768   :  { %v940_v43 = vpop.eup %939 }
 0x769   :  { %v398_v44 = vadd.f32 1.0, %v940_v43 }
 0x76b   :  { %941 = vrcp.f32 %v398_v44  ;;  %v410_v6 = vand.u32 2147483648, %v398_v44  ;;  %vm404_vm4 = vweird.f32 %v398_v44  ;;  %v408_v47 = vand.u32 2147483647, %v398_v44 }
 0x76d   :  { %v411_v49 = vor.u32 1.1754944e-38, %v410_v6  ;;  %vm409_vm6 = vcmp.eq.f32.partialorder %v408_v47, 8.507059e+37 }
 0x771   :  { %v942_v0 = vpop.eup %941 }
 0x772   :  { %v400_v1 = vmul.f32 %v942_v0, %v398_v44  ;;  %vm405_vm0 = vweird.f32 %v942_v0 }
 0x773   :  { %vm406_vm5 = vmor %vm404_vm4, %vm405_vm0 }
 0x774   :  { %v401_v45 = vsub.f32 1.0, %v400_v1 }
 0x776   :  { %v402_v2 = vmul.f32 %v942_v0, %v401_v45 }
 0x778   :  { %v403_v46 = vadd.f32 %v942_v0, %v402_v2 }
 0x77a   :  { %v407_v48 = vsel %vm406_vm5, %v942_v0, %v403_v46 }
 0x77b   :  { %v412_v51 = vsel %vm409_vm6, %v411_v49, %v407_v48 }
 0x77c   :  { %v415_v53 = vmul.f32 %v412_v51, %v334_v32 }
 0x7d9   :  { %v418_v50 = vpop.permute.xlu1 %417 }
 0x7da   :  { %v420_v52 = vmul.f32 %v418_v50, %v412_v51  ;;  %v892_v50 = vld [vmem:[%s1315_s0 + $0xc] sm:$0x3] }
 0x7db   :  { %895 = vmatmul.msk.f32.vlgmr.msrb.gmra.mxu3 %vm86_vm2, %v892_v50 }
 0x7dc   :  { %422 = vrot.lane.b32.xlu2 %v420_v52, %s1083_s20 }
 0x836   :  { %v423_v54 = vpop.permute.xlu2 %422 }
 0x837   :  { %v425_v55 = vadd.f32 %v423_v54, %v415_v53 }
 0x839   :  { %943 = vtanh.f32 %v425_v55 }
 0x83f   :  { %v944_v56 = vpop.eup %943 }
 0x840   :  { %428 = vrot.lane.b32.xlu0 %v944_v56, %s1082_s19 }
 0x85e   :  { %v664_v54 = vpop.f32.mrf.mxu3 }
 0x8b2   :  { %v429_v58 = vpop.permute.xlu0 %428 }
 0x8b3   :  { %v431_v59 = vmul.f32 %v429_v58, %v412_v51 }
 0x8b5   :  { %433 = vrot.lane.b32.xlu1 %v431_v59, %s1083_s20 }
 0x927   :  { %v434_v60 = vpop.permute.xlu1 %433 }
 0x928   :  { %437 = vst.msk [vmem:[#allocation7 + $0x6] sm:$0x3] %vm49_vm1, %v434_v60  ;;  %883 = vmatmul.msk.f32.vlgmr.msra.gmra.mxu1 %vm62_vm3, %v434_v60 }
 0x9a5   :  { %v459_v62 = vpop.f32.mrf.mxu1 }
 0x9a6   :  { %v483_v63 = vadd.f32 %v482_v61, %v459_v62 }
 0x9a8   :  { %v485_v4 = vadd.f32 %v1198_v10, %v483_v63 }
 0x9aa   :  { %945 = vtanh.f32 %v485_v4  ;;  %v886_v7 = vmul.f32 -1.442695, %v485_v4 }
 0x9ac   :  { %947 = vpow2.f32 %v886_v7 }
 0x9b0   :  { %v946_v5 = vpop.eup %945 }
 0x9b1   :  { %508 = vrot.lane.b32.xlu2 %v946_v5, %s1082_s19 }
 0x9b2   :  { %v948_v8 = vpop.eup %947 }
 0x9b3   :  { %v489_v9 = vadd.f32 1.0, %v948_v8 }
 0x9b5   :  { %949 = vrcp.f32 %v489_v9  ;;  %v501_v16 = vand.u32 2147483648, %v489_v9  ;;  %vm495_vm8 = vweird.f32 %v489_v9  ;;  %v499_v17 = vand.u32 2147483647, %v489_v9 }
 0x9b7   :  { %v502_v19 = vor.u32 1.1754944e-38, %v501_v16  ;;  %vm500_vm10 = vcmp.eq.f32.partialorder %v499_v17, 8.507059e+37 }
 0x9bb   :  { %v950_v11 = vpop.eup %949 }
 0x9bc   :  { %v491_v12 = vmul.f32 %v950_v11, %v489_v9  ;;  %vm496_vm7 = vweird.f32 %v950_v11 }
 0x9bd   :  { %vm497_vm9 = vmor %vm495_vm8, %vm496_vm7 }
 0x9be   :  { %v492_v13 = vsub.f32 1.0, %v491_v12 }
 0x9c0   :  { %v493_v14 = vmul.f32 %v950_v11, %v492_v13 }
 0x9c2   :  { %v494_v15 = vadd.f32 %v950_v11, %v493_v14 }
 0x9c4   :  { %v498_v18 = vsel %vm497_vm9, %v950_v11, %v494_v15 }
 0x9c5   :  { %v503_v21 = vsel %vm500_vm10, %v502_v19, %v498_v18 }
 0x9c6   :  { %v506_v23 = vmul.f32 %v503_v21, %v425_v55 }
 0xa0b   :  { %v509_v20 = vpop.permute.xlu2 %508 }
 0xa0c   :  { %v511_v22 = vmul.f32 %v509_v20, %v503_v21  ;;  %v897_v20 = vld [vmem:[%s1315_s0 + $0xe] sm:$0x3]  ;;  %s1084_s0 = smov 96  }
 0xa0d   :  { %900 = vmatmul.msk.f32.vlgmr.msrb.gmra.mxu2 %vm86_vm2, %v897_v20 }
 0xa0e   :  { %513 = vrot.lane.b32.xlu0 %v511_v22, %s1083_s20 }
 0xa80   :  { %v514_v24 = vpop.permute.xlu0 %513 }
 0xa81   :  { %v516_v25 = vadd.f32 %v514_v24, %v506_v23 }
 0xa83   :  { %951 = vtanh.f32 %v516_v25 }
 0xa89   :  { %v952_v26 = vpop.eup %951 }
 0xa8a   :  { %519 = vrot.lane.b32.xlu1 %v952_v26, %s1082_s19 }
 0xa90   :  { %v755_v24 = vpop.f32.mrf.mxu2 }
 0xafc   :  { %v520_v28 = vpop.permute.xlu1 %519 }
 0xafd   :  { %v522_v29 = vmul.f32 %v520_v28, %v503_v21 }
 0xaff   :  { %524 = vrot.lane.b32.xlu2 %v522_v29, %s1083_s20 }
 0xb59   :  { %v525_v30 = vpop.permute.xlu2 %524 }
 0xb5a   :  { %528 = vst.msk [vmem:[#allocation7 + $0x8] sm:$0x3] %vm49_vm1, %v525_v30  ;;  %888 = vmatmul.msk.f32.vlgmr.msra.gmra.mxu0 %vm62_vm3, %v525_v30 }
 0xbd7   :  { %v550_v32 = vpop.f32.mrf.mxu0 }
 0xbd8   :  { %v574_v33 = vadd.f32 %v573_v31, %v550_v32 }
 0xbda   :  { %v576_v34 = vadd.f32 %v1198_v10, %v574_v33 }
 0xbdc   :  { %953 = vtanh.f32 %v576_v34  ;;  %v891_v36 = vmul.f32 -1.442695, %v576_v34 }
 0xbde   :  { %955 = vpow2.f32 %v891_v36 }
 0xbe2   :  { %v954_v35 = vpop.eup %953 }
 0xbe3   :  { %599 = vrot.lane.b32.xlu0 %v954_v35, %s1082_s19 }
 0xbe4   :  { %v956_v37 = vpop.eup %955 }
 0xbe5   :  { %v580_v38 = vadd.f32 1.0, %v956_v37 }
 0xbe7   :  { %957 = vrcp.f32 %v580_v38  ;;  %v592_v43 = vand.u32 2147483648, %v580_v38  ;;  %vm586_vm12 = vweird.f32 %v580_v38  ;;  %v590_v44 = vand.u32 2147483647, %v580_v38 }
 0xbe9   :  { %v593_v1 = vor.u32 1.1754944e-38, %v592_v43  ;;  %vm591_vm14 = vcmp.eq.f32.partialorder %v590_v44, 8.507059e+37 }
 0xbed   :  { %v958_v39 = vpop.eup %957 }
 0xbee   :  { %v582_v3 = vmul.f32 %v958_v39, %v580_v38  ;;  %vm587_vm11 = vweird.f32 %v958_v39 }
 0xbef   :  { %vm588_vm13 = vmor %vm586_vm12, %vm587_vm11 }
 0xbf0   :  { %v583_v40 = vsub.f32 1.0, %v582_v3 }
 0xbf2   :  { %v584_v41 = vmul.f32 %v958_v39, %v583_v40 }
 0xbf4   :  { %v585_v42 = vadd.f32 %v958_v39, %v584_v41 }
 0xbf6   :  { %v589_v0 = vsel %vm588_vm13, %v958_v39, %v585_v42 }
 0xbf7   :  { %v594_v2 = vsel %vm591_vm14, %v593_v1, %v589_v0 }
 0xbf8   :  { %v597_v6 = vmul.f32 %v594_v2, %v516_v25 }
 0xc55   :  { %v600_v45 = vpop.permute.xlu0 %599 }
 0xc56   :  { %v602_v46 = vmul.f32 %v600_v45, %v594_v2 }
 0xc58   :  { %604 = vrot.lane.b32.xlu1 %v602_v46, %s1083_s20 }
 0xcca   :  { %v605_v47 = vpop.permute.xlu1 %604 }
 0xccb   :  { %v607_v48 = vadd.f32 %v605_v47, %v597_v6 }
 0xccd   :  { %959 = vtanh.f32 %v607_v48 }
 0xcd3   :  { %v960_v49 = vpop.eup %959 }
 0xcd4   :  { %610 = vrot.lane.b32.xlu2 %v960_v49, %s1082_s19 }
 0xd2e   :  { %v611_v51 = vpop.permute.xlu2 %610 }
 0xd2f   :  { %v613_v52 = vmul.f32 %v611_v51, %v594_v2 }
 0xd31   :  { %615 = vrot.lane.b32.xlu0 %v613_v52, %s1083_s20 }
 0xda3   :  { %v616_v53 = vpop.permute.xlu0 %615 }
 0xda4   :  { %619 = vst.msk [vmem:[#allocation7 + $0xa] sm:$0x3] %vm49_vm1, %v616_v53  ;;  %893 = vmatmul.msk.f32.vlgmr.msrb.gmra.mxu1 %vm62_vm3, %v616_v53 }
 0xe21   :  { %v641_v55 = vpop.f32.mrf.mxu1 }
 0xe22   :  { %v665_v56 = vadd.f32 %v664_v54, %v641_v55 }
 0xe24   :  { %v667_v57 = vadd.f32 %v1198_v10, %v665_v56 }
 0xe26   :  { %961 = vtanh.f32 %v667_v57  ;;  %v896_v59 = vmul.f32 -1.442695, %v667_v57 }
 0xe28   :  { %963 = vpow2.f32 %v896_v59 }
 0xe2c   :  { %v962_v58 = vpop.eup %961 }
 0xe2d   :  { %690 = vrot.lane.b32.xlu1 %v962_v58, %s1082_s19 }
 0xe2e   :  { %v964_v60 = vpop.eup %963 }
 0xe2f   :  { %v671_v61 = vadd.f32 1.0, %v964_v60 }
 0xe31   :  { %965 = vrcp.f32 %v671_v61  ;;  %v683_v8 = vand.u32 2147483648, %v671_v61  ;;  %vm677_vm0 = vweird.f32 %v671_v61  ;;  %v681_v9 = vand.u32 2147483647, %v671_v61 }
 0xe33   :  { %v684_v12 = vor.u32 1.1754944e-38, %v683_v8  ;;  %vm682_vm5 = vcmp.eq.f32.partialorder %v681_v9, 8.507059e+37 }
 0xe37   :  { %v966_v62 = vpop.eup %965 }
 0xe38   :  { %v673_v63 = vmul.f32 %v966_v62, %v671_v61  ;;  %vm678_vm15 = vweird.f32 %v966_v62 }
 0xe39   :  { %vm679_vm4 = vmor %vm677_vm0, %vm678_vm15 }
 0xe3a   :  { %v674_v4 = vsub.f32 1.0, %v673_v63 }
 0xe3c   :  { %v675_v5 = vmul.f32 %v966_v62, %v674_v4 }
 0xe3e   :  { %v676_v7 = vadd.f32 %v966_v62, %v675_v5 }
 0xe40   :  { %v680_v11 = vsel %vm679_vm4, %v966_v62, %v676_v7 }
 0xe41   :  { %v685_v14 = vsel %vm682_vm5, %v684_v12, %v680_v11 }
 0xe42   :  { %v688_v16 = vmul.f32 %v685_v14, %v607_v48 }
 0xe9f   :  { %v691_v13 = vpop.permute.xlu1 %690 }
 0xea0   :  { %v693_v15 = vmul.f32 %v691_v13, %v685_v14 }
 0xea2   :  { %695 = vrot.lane.b32.xlu2 %v693_v15, %s1083_s20 }
 0xefc   :  { %v696_v17 = vpop.permute.xlu2 %695 }
 0xefd   :  { %v698_v18 = vadd.f32 %v696_v17, %v688_v16 }
 0xeff   :  { %967 = vtanh.f32 %v698_v18 }
 0xf05   :  { %v968_v19 = vpop.eup %967 }
 0xf06   :  { %701 = vrot.lane.b32.xlu0 %v968_v19, %s1082_s19 }
 0xf78   :  { %v702_v21 = vpop.permute.xlu0 %701 }
 0xf79   :  { %v704_v22 = vmul.f32 %v702_v21, %v685_v14 }
 0xf7b   :  { %706 = vrot.lane.b32.xlu1 %v704_v22, %s1083_s20 }
 0xfed   :  { %v707_v23 = vpop.permute.xlu1 %706 }
 0xfee   :  { %710 = vst.msk [vmem:[#allocation7 + $0xc] sm:$0x3] %vm49_vm1, %v707_v23  ;;  %898 = vmatmul.msk.f32.vlgmr.msrb.gmra.mxu0 %vm62_vm3, %v707_v23 }
0x106b   :  { %v732_v25 = vpop.f32.mrf.mxu0 }
0x106c   :  { %v756_v26 = vadd.f32 %v755_v24, %v732_v25 }
0x106e   :  { %v758_v27 = vadd.f32 %v1198_v10, %v756_v26 }
0x1070   :  { %969 = vtanh.f32 %v758_v27  ;;  %v901_v29 = vmul.f32 -1.442695, %v758_v27 }
0x1072   :  { %971 = vpow2.f32 %v901_v29 }
0x1076   :  { %v970_v28 = vpop.eup %969 }
0x1077   :  { %781 = vrot.lane.b32.xlu2 %v970_v28, %s1082_s19 }
0x1078   :  { %v972_v30 = vpop.eup %971 }
0x1079   :  { %v762_v31 = vadd.f32 1.0, %v972_v30 }
0x107b   :  { %973 = vrcp.f32 %v762_v31  ;;  %v774_v37 = vand.u32 2147483648, %v762_v31  ;;  %vm768_vm3 = vweird.f32 %v762_v31  ;;  %v772_v38 = vand.u32 2147483647, %v762_v31 }
0x107d   :  { %v775_v39 = vor.u32 1.1754944e-38, %v774_v37  ;;  %vm773_vm7 = vcmp.eq.f32.partialorder %v772_v38, 8.507059e+37 }
0x1081   :  { %v974_v32 = vpop.eup %973 }
0x1082   :  { %v764_v33 = vmul.f32 %v974_v32, %v762_v31  ;;  %vm769_vm2 = vweird.f32 %v974_v32 }
0x1083   :  { %vm770_vm6 = vmor %vm768_vm3, %vm769_vm2 }
0x1084   :  { %v765_v34 = vsub.f32 1.0, %v764_v33 }
0x1086   :  { %v766_v35 = vmul.f32 %v974_v32, %v765_v34 }
0x1088   :  { %v767_v36 = vadd.f32 %v974_v32, %v766_v35 }
0x108a   :  { %v771_v10 = vsel %vm770_vm6, %v974_v32, %v767_v36 }
0x108b   :  { %v776_v40 = vsel %vm773_vm7, %v775_v39, %v771_v10 }
0x108c   :  { %v779_v42 = vmul.f32 %v776_v40, %v698_v18 }
0x10d1   :  { %v782_v3 = vpop.permute.xlu2 %781 }
0x10d2   :  { %v784_v41 = vmul.f32 %v782_v3, %v776_v40 }
0x10d4   :  { %786 = vrot.lane.b32.xlu0 %v784_v41, %s1083_s20 }
0x1146   :  { %v787_v43 = vpop.permute.xlu0 %786 }
0x1147   :  { %v789_v44 = vadd.f32 %v787_v43, %v779_v42 }
0x1149   :  { %975 = vtanh.f32 %v789_v44  ;;  %804 = vrot.lane.b32.xlu0 %v789_v44, %s1084_s0 }
0x114f   :  { %v976_v0 = vpop.eup %975 }
0x1150   :  { %792 = vrot.lane.b32.xlu1 %v976_v0, %s1082_s19  ;;  %s842_s19 = sshll.u32 %s1087_s18, 4  ;;  %s843_s19 = int_to_ptr.vmem [resolvable:$true] %s842_s19 }
0x11bb   :  { %v805_v1 = vpop.permute.xlu0 %804 }
0x11bc   :  { %807 = vst.msk [vmem:[#allocation3] sm:$0x3] %vm49_vm1, %v805_v1 }
0x11bd   :  { %812 = vst.msk [vmem:[#allocation10] sm:$0x3] %vm49_vm1, %v805_v1 }
0x11c2   :  { %v793_v45 = vpop.permute.xlu1 %792 }
0x11c3   :  { %v795_v2 = vmul.f32 %v793_v45, %v776_v40 }
0x11c5   :  { %797 = vrot.lane.b32.xlu2 %v795_v2, %s1083_s20 }
0x121f   :  { %v798_v46 = vpop.permute.xlu2 %797 }
0x1220   :  { %801 = vst.msk [vmem:[#allocation7 + $0xe] sm:$0x3] %vm49_vm1, %v798_v46 }
0x1221   :  { %802 = vst.msk [vmem:[#allocation2] sm:$0x3] %vm49_vm1, %v798_v46  ;;  %825 = dma.vmem_to_hbm [thread:$0]  %s818_s16, 256, %s820_s12, [#allocation6], %s1083_s20, %s1083_s20, %s1088_s6  }
0x1222   :  { %811 = vst.msk [vmem:[#allocation8] sm:$0x3] %vm49_vm1, %v798_v46 }
0x1223   :  { %836 = dma.vmem_to_hbm [thread:$0]  %s832_s14, 32, %s834_s17, [#allocation9]  }
0x1224   :  { %847 = dma.vmem_to_hbm [thread:$0]  %s843_s19, 32, %s845_s21, [#allocation9]  }
0x1225   :  { %1075 = dma.done.wait [#allocation6], 256  }
0x1226   :  { %1076 = vsyncadd [#allocation6], 4294967040 }
0x1227   :  { %1077 = dma.done.wait [#allocation9], 64  }
0x1228   :  { %1078 = vsyncadd [#allocation9], 4294967232 }
0x1229   :  { %860 = vsyncpa [#allocation5], 1 }
0x122a   :  { %861 = vsyncpa [#allocation6], 1 }
0x122b   :  { %862 = vsyncpa [#allocation9], 1 }

</bundles_post_ra>
